<compile_context>
chip_gen: v6e
topology: v6e:2x2x1
jax: 0.10.0
libtpu: 0.0.40
codegen_flags: <defaults>
</compile_context>

<pallas_src>
import jax
import jax.numpy as jnp
from jax import lax
from jax.experimental import pallas as pl
from jax.experimental.pallas import tpu as pltpu


# ----------------------- static problem configuration -------------------------
N, C, H, W = 2, 3, 16, 16          # ImageNet normalization implies 3 channels
C_OUT, N_CLS = 8, 10
KH, KW = 3, 3
HP, WP = H + 2, W + 2              # zero-pad=1 conv -> padded grid
L_IMG = HP * WP                    # conv evaluated on the whole padded grid
MARGIN = WP + 1                    # max |tap offset| on the flattened grid
LBUF = L_IMG + 2 * MARGIN          # flattened per-image buffer length

IMAGENET_MEAN = (0.485, 0.456, 0.406)
IMAGENET_STD = (0.229, 0.224, 0.225)


# ----------------------------- fused kernel -----------------------------------

def fused_forward_kernel(x_ref, w_ref, b_ref, pool_ref, cw_ref, cb_ref, o_ref):
    """One image: (folded-normalize) conv3x3 -> ReLU -> global-avg-pool -> linear.

    x_ref    : [C, LBUF]        flattened, mean-padded image (+margins), VMEM resident
    w_ref    : [KH*KW, C_OUT, C] conv weights (scaled by 1/std), one slice per tap
    b_ref    : [C_OUT, 1]       folded conv bias
    pool_ref : [1, L_IMG]       1/(H*W) on interior positions, 0 on the pad ring
    cw_ref   : [N_CLS, C_OUT]   classifier weight
    cb_ref   : [N_CLS, 1]       classifier bias
    o_ref    : [N_CLS, 1]       logits column for this image
    """
    xb = x_ref[...]                                     # [C, LBUF], stays in vregs/VMEM

    # Conv as 9 shifted matmuls on the flattened padded grid.
    # acc layout is lane-dense: [C_OUT=8 sublanes, L_IMG=324 lanes].
    acc = None
    for t in range(KH * KW):
        dy, dx = t // KW, t % KW
        start = MARGIN + (dy - 1) * WP + (dx - 1)       # static lane offset
        patch = xb[:, start:start + L_IMG]              # [C, L_IMG]
        d = jnp.dot(w_ref[t], patch, preferred_element_type=jnp.float32)
        acc = d if acc is None else acc + d

    feat = jnp.maximum(acc + b_ref[...], 0.0)           # [C_OUT, L_IMG], ReLU

    # Classifier applied before the (linear) pooling: [N_CLS, L_IMG] on the MXU.
    t1 = jnp.dot(cw_ref[...], feat, preferred_element_type=jnp.float32)

    # Global average pool + crop of the pad ring, folded into one masked lane
    # reduction (mask is 1/(H*W) on interior positions, 0 elsewhere).
    logits = jnp.sum(t1 * pool_ref[...], axis=1, keepdims=True) + cb_ref[...]
    o_ref[...] = logits                                  # [N_CLS, 1]


# ------------------------------- wrapper ---------------------------------------

def total_model_forward(x_nchw, params, ssim=True):
    """Forward pass mirroring total_model(encoder, classifier, ssim=True)."""
    conv_w = params["conv_w"].astype(jnp.float32)        # [C_OUT, C, KH, KW]
    conv_b = params["conv_b"].astype(jnp.float32)        # [C_OUT]
    cls_w = params["cls_w"].astype(jnp.float32)          # [N_CLS, C_OUT]
    cls_b = params["cls_b"].astype(jnp.float32)          # [N_CLS]
    x = x_nchw.astype(jnp.float32)                       # [N, C, H, W]
    assert x.shape == (N, C, H, W)

    if ssim:
        mean = jnp.array(IMAGENET_MEAN, jnp.float32).reshape(1, C, 1, 1)
        std = jnp.array(IMAGENET_STD, jnp.float32).reshape(1, C, 1, 1)
        # Fold (x - mean)/std into the conv weights and bias.
        w_eff = conv_w / std                                        # scale per in-channel
        b_eff = conv_b - jnp.sum(w_eff * mean, axis=(1, 2, 3))      # mean correction
        # Pad ring must hold the per-channel mean so it maps to 0 after the fold
        # (equivalent to PyTorch's zero padding of the *normalized* tensor).
        xpad = jnp.pad(x - mean, ((0, 0), (0, 0), (1, 1), (1, 1))) + mean
    else:
        w_eff, b_eff = conv_w, conv_b
        xpad = jnp.pad(x, ((0, 0), (0, 0), (1, 1), (1, 1)))

    # Flatten the padded grid and add a margin so every static tap shift stays
    # in-bounds (garbage only lands on pad-ring outputs, which the pool mask zeroes).
    xbuf = jnp.pad(xpad.reshape(N, C, L_IMG), ((0, 0), (0, 0), (MARGIN, MARGIN)))

    # Per-tap weight slices in the kernel's [C_OUT, C] layout.
    w_taps = jnp.transpose(w_eff, (2, 3, 0, 1)).reshape(KH * KW, C_OUT, C)
    b_col = b_eff.reshape(C_OUT, 1)
    cb_col = cls_b.reshape(N_CLS, 1)

    # Pool mask: 1/(H*W) on interior (real-output) positions of the padded grid.
    pool_mask = jnp.zeros((HP, WP), jnp.float32).at[1:1 + H, 1:1 + W].set(1.0 / (H * W))
    pool_row = pool_mask.reshape(1, L_IMG)

    out = pl.pallas_call(
        fused_forward_kernel,
        out_shape=jax.ShapeDtypeStruct((N, N_CLS, 1), jnp.float32),
        grid=(N,),  # one program per image; "parallel" -> both TCs on v7x
        in_specs=[
            pl.BlockSpec((None, C, LBUF), lambda i: (i, 0, 0)),        # per-image slab
            pl.BlockSpec((KH * KW, C_OUT, C), lambda i: (0, 0, 0)),    # resident weights
            pl.BlockSpec((C_OUT, 1), lambda i: (0, 0)),
            pl.BlockSpec((1, L_IMG), lambda i: (0, 0)),
            pl.BlockSpec((N_CLS, C_OUT), lambda i: (0, 0)),
            pl.BlockSpec((N_CLS, 1), lambda i: (0, 0)),
        ],
        out_specs=pl.BlockSpec((None, N_CLS, 1), lambda i: (i, 0, 0)),
        compiler_params=pltpu.CompilerParams(
            dimension_semantics=("parallel",)),
    )(xbuf, w_taps, b_col, pool_row, cls_w, cb_col)

    return out.reshape(N, N_CLS)


# ----------------------------- reference (pure JAX) ----------------------------

def reference_forward(x_nchw, params, ssim=True):
    conv_w, conv_b, cls_w, cls_b = (
        params["conv_w"], params["conv_b"], params["cls_w"], params["cls_b"]
    )
    x = x_nchw.astype(jnp.float32)
    if ssim:
        mean = jnp.array(IMAGENET_MEAN, jnp.float32).reshape(1, C, 1, 1)
        std = jnp.array(IMAGENET_STD, jnp.float32).reshape(1, C, 1, 1)
        x = (x - mean) / std
    y = lax.conv_general_dilated(
        x, conv_w, window_strides=(1, 1), padding="SAME",
        dimension_numbers=("NCHW", "OIHW", "NCHW"),
    )
    y = jnp.maximum(y + conv_b[None, :, None, None], 0.0)
    pooled = jnp.mean(y, axis=(2, 3))
    return pooled @ cls_w.T + cls_b


# ---------------------------------- main ---------------------------------------

if __name__ == "__main__":
    key = jax.random.PRNGKey(0)
    k_x, k_cw, k_cb, k_lw, k_lb = jax.random.split(key, 5)

    x = jax.random.uniform(k_x, (N, C, H, W), jnp.float32)   # image-like in [0, 1]

    params = {
        "conv_w": jax.random.normal(k_cw, (C_OUT, C, KH, KW), jnp.float32) * 0.1,
        "conv_b": jax.random.normal(k_cb, (C_OUT,), jnp.float32) * 0.1,
        "cls_w": jax.random.normal(k_lw, (N_CLS, C_OUT), jnp.float32) * 0.1,
        "cls_b": jax.random.normal(k_lb, (N_CLS,), jnp.float32) * 0.1,
    }

    logits = jax.block_until_ready(total_model_forward(x, params, ssim=True))
    ref = reference_forward(x, params, ssim=True)

    assert logits.shape == (N, N_CLS)
    assert jnp.allclose(logits, ref, rtol=1e-4, atol=1e-4), "mismatch vs reference"

    print("KERNEL_OK")
</pallas_src>

<mosaic_0001>
module attributes {stable_mosaic.version = 11 : i64} {
  func.func @fused_forward_kernel(%arg0: i32, %arg1: memref<1x3x362xf32, #tpu.memory_space<vmem>>, %arg2: memref<9x8x3xf32, #tpu.memory_space<vmem>>, %arg3: memref<8x1xf32, #tpu.memory_space<vmem>>, %arg4: memref<1x324xf32, #tpu.memory_space<vmem>>, %arg5: memref<10x8xf32, #tpu.memory_space<vmem>>, %arg6: memref<10x1xf32, #tpu.memory_space<vmem>>, %arg7: memref<1x10x1xf32, #tpu.memory_space<vmem>>) attributes {dimension_semantics = [#tpu.dimension_semantics<parallel>], iteration_bounds = array<i64: 2>, scalar_prefetch = 0 : i64, scratch_operands = 0 : i64, tpu.core_type = #tpu.core_type<tc>, window_params = [{transform_indices = @transform_0, window_bounds = array<i64: 1, 3, 362>}, {pipeline_mode = #tpu.pipeline_mode<synchronous>, transform_indices = @transform_1, window_bounds = array<i64: 9, 8, 3>}, {pipeline_mode = #tpu.pipeline_mode<synchronous>, transform_indices = @transform_2, window_bounds = array<i64: 8, 1>}, {pipeline_mode = #tpu.pipeline_mode<synchronous>, transform_indices = @transform_3, window_bounds = array<i64: 1, 324>}, {pipeline_mode = #tpu.pipeline_mode<synchronous>, transform_indices = @transform_4, window_bounds = array<i64: 10, 8>}, {pipeline_mode = #tpu.pipeline_mode<synchronous>, transform_indices = @transform_5, window_bounds = array<i64: 10, 1>}, {transform_indices = @transform_6, window_bounds = array<i64: 1, 10, 1>}]} {
    %c0 = arith.constant 0 : index
    %c0_0 = arith.constant 0 : index
    %c0_1 = arith.constant 0 : index
    %0 = vector.load %arg1[%c0, %c0_0, %c0_1] : memref<1x3x362xf32, #tpu.memory_space<vmem>>, vector<1x3x362xf32>
    %1 = vector.shape_cast %0 : vector<1x3x362xf32> to vector<3x362xf32>
    %2 = vector.extract_strided_slice %1 {offsets = [0, 0], sizes = [3, 324], strides = [1, 1]} : vector<3x362xf32> to vector<3x324xf32>
    %c0_2 = arith.constant 0 : index
    %c0_3 = arith.constant 0 : index
    %c0_4 = arith.constant 0 : index
    %3 = vector.load %arg2[%c0_2, %c0_3, %c0_4] : memref<9x8x3xf32, #tpu.memory_space<vmem>>, vector<1x8x3xf32>
    %4 = vector.shape_cast %3 : vector<1x8x3xf32> to vector<8x3xf32>
    %cst = arith.constant dense<0.000000e+00> : vector<8x324xf32>
    %5 = tpu.matmul %4, %2, %cst {dimension_numbers = #tpu.dot_dimension_numbers<[1], [0], [0], [1], [0, 0, 1, 1], [], []>} : vector<8x3xf32>, vector<3x324xf32>, vector<8x324xf32> -> vector<8x324xf32>
    %6 = vector.extract_strided_slice %1 {offsets = [0, 1], sizes = [3, 324], strides = [1, 1]} : vector<3x362xf32> to vector<3x324xf32>
    %c1 = arith.constant 1 : index
    %c0_5 = arith.constant 0 : index
    %c0_6 = arith.constant 0 : index
    %7 = vector.load %arg2[%c1, %c0_5, %c0_6] : memref<9x8x3xf32, #tpu.memory_space<vmem>>, vector<1x8x3xf32>
    %8 = vector.shape_cast %7 : vector<1x8x3xf32> to vector<8x3xf32>
    %cst_7 = arith.constant dense<0.000000e+00> : vector<8x324xf32>
    %9 = tpu.matmul %8, %6, %cst_7 {dimension_numbers = #tpu.dot_dimension_numbers<[1], [0], [0], [1], [0, 0, 1, 1], [], []>} : vector<8x3xf32>, vector<3x324xf32>, vector<8x324xf32> -> vector<8x324xf32>
    %10 = arith.addf %5, %9 : vector<8x324xf32>
    %11 = vector.extract_strided_slice %1 {offsets = [0, 2], sizes = [3, 324], strides = [1, 1]} : vector<3x362xf32> to vector<3x324xf32>
    %c2 = arith.constant 2 : index
    %c0_8 = arith.constant 0 : index
    %c0_9 = arith.constant 0 : index
    %12 = vector.load %arg2[%c2, %c0_8, %c0_9] : memref<9x8x3xf32, #tpu.memory_space<vmem>>, vector<1x8x3xf32>
    %13 = vector.shape_cast %12 : vector<1x8x3xf32> to vector<8x3xf32>
    %cst_10 = arith.constant dense<0.000000e+00> : vector<8x324xf32>
    %14 = tpu.matmul %13, %11, %cst_10 {dimension_numbers = #tpu.dot_dimension_numbers<[1], [0], [0], [1], [0, 0, 1, 1], [], []>} : vector<8x3xf32>, vector<3x324xf32>, vector<8x324xf32> -> vector<8x324xf32>
    %15 = arith.addf %10, %14 : vector<8x324xf32>
    %16 = vector.extract_strided_slice %1 {offsets = [0, 18], sizes = [3, 324], strides = [1, 1]} : vector<3x362xf32> to vector<3x324xf32>
    %c3 = arith.constant 3 : index
    %c0_11 = arith.constant 0 : index
    %c0_12 = arith.constant 0 : index
    %17 = vector.load %arg2[%c3, %c0_11, %c0_12] : memref<9x8x3xf32, #tpu.memory_space<vmem>>, vector<1x8x3xf32>
    %18 = vector.shape_cast %17 : vector<1x8x3xf32> to vector<8x3xf32>
    %cst_13 = arith.constant dense<0.000000e+00> : vector<8x324xf32>
    %19 = tpu.matmul %18, %16, %cst_13 {dimension_numbers = #tpu.dot_dimension_numbers<[1], [0], [0], [1], [0, 0, 1, 1], [], []>} : vector<8x3xf32>, vector<3x324xf32>, vector<8x324xf32> -> vector<8x324xf32>
    %20 = arith.addf %15, %19 : vector<8x324xf32>
    %21 = vector.extract_strided_slice %1 {offsets = [0, 19], sizes = [3, 324], strides = [1, 1]} : vector<3x362xf32> to vector<3x324xf32>
    %c4 = arith.constant 4 : index
    %c0_14 = arith.constant 0 : index
    %c0_15 = arith.constant 0 : index
    %22 = vector.load %arg2[%c4, %c0_14, %c0_15] : memref<9x8x3xf32, #tpu.memory_space<vmem>>, vector<1x8x3xf32>
    %23 = vector.shape_cast %22 : vector<1x8x3xf32> to vector<8x3xf32>
    %cst_16 = arith.constant dense<0.000000e+00> : vector<8x324xf32>
    %24 = tpu.matmul %23, %21, %cst_16 {dimension_numbers = #tpu.dot_dimension_numbers<[1], [0], [0], [1], [0, 0, 1, 1], [], []>} : vector<8x3xf32>, vector<3x324xf32>, vector<8x324xf32> -> vector<8x324xf32>
    %25 = arith.addf %20, %24 : vector<8x324xf32>
    %26 = vector.extract_strided_slice %1 {offsets = [0, 20], sizes = [3, 324], strides = [1, 1]} : vector<3x362xf32> to vector<3x324xf32>
    %c5 = arith.constant 5 : index
    %c0_17 = arith.constant 0 : index
    %c0_18 = arith.constant 0 : index
    %27 = vector.load %arg2[%c5, %c0_17, %c0_18] : memref<9x8x3xf32, #tpu.memory_space<vmem>>, vector<1x8x3xf32>
    %28 = vector.shape_cast %27 : vector<1x8x3xf32> to vector<8x3xf32>
    %cst_19 = arith.constant dense<0.000000e+00> : vector<8x324xf32>
    %29 = tpu.matmul %28, %26, %cst_19 {dimension_numbers = #tpu.dot_dimension_numbers<[1], [0], [0], [1], [0, 0, 1, 1], [], []>} : vector<8x3xf32>, vector<3x324xf32>, vector<8x324xf32> -> vector<8x324xf32>
    %30 = arith.addf %25, %29 : vector<8x324xf32>
    %31 = vector.extract_strided_slice %1 {offsets = [0, 36], sizes = [3, 324], strides = [1, 1]} : vector<3x362xf32> to vector<3x324xf32>
    %c6 = arith.constant 6 : index
    %c0_20 = arith.constant 0 : index
    %c0_21 = arith.constant 0 : index
    %32 = vector.load %arg2[%c6, %c0_20, %c0_21] : memref<9x8x3xf32, #tpu.memory_space<vmem>>, vector<1x8x3xf32>
    %33 = vector.shape_cast %32 : vector<1x8x3xf32> to vector<8x3xf32>
    %cst_22 = arith.constant dense<0.000000e+00> : vector<8x324xf32>
    %34 = tpu.matmul %33, %31, %cst_22 {dimension_numbers = #tpu.dot_dimension_numbers<[1], [0], [0], [1], [0, 0, 1, 1], [], []>} : vector<8x3xf32>, vector<3x324xf32>, vector<8x324xf32> -> vector<8x324xf32>
    %35 = arith.addf %30, %34 : vector<8x324xf32>
    %36 = vector.extract_strided_slice %1 {offsets = [0, 37], sizes = [3, 324], strides = [1, 1]} : vector<3x362xf32> to vector<3x324xf32>
    %c7 = arith.constant 7 : index
    %c0_23 = arith.constant 0 : index
    %c0_24 = arith.constant 0 : index
    %37 = vector.load %arg2[%c7, %c0_23, %c0_24] : memref<9x8x3xf32, #tpu.memory_space<vmem>>, vector<1x8x3xf32>
    %38 = vector.shape_cast %37 : vector<1x8x3xf32> to vector<8x3xf32>
    %cst_25 = arith.constant dense<0.000000e+00> : vector<8x324xf32>
    %39 = tpu.matmul %38, %36, %cst_25 {dimension_numbers = #tpu.dot_dimension_numbers<[1], [0], [0], [1], [0, 0, 1, 1], [], []>} : vector<8x3xf32>, vector<3x324xf32>, vector<8x324xf32> -> vector<8x324xf32>
    %40 = arith.addf %35, %39 : vector<8x324xf32>
    %41 = vector.extract_strided_slice %1 {offsets = [0, 38], sizes = [3, 324], strides = [1, 1]} : vector<3x362xf32> to vector<3x324xf32>
    %c8 = arith.constant 8 : index
    %c0_26 = arith.constant 0 : index
    %c0_27 = arith.constant 0 : index
    %42 = vector.load %arg2[%c8, %c0_26, %c0_27] : memref<9x8x3xf32, #tpu.memory_space<vmem>>, vector<1x8x3xf32>
    %43 = vector.shape_cast %42 : vector<1x8x3xf32> to vector<8x3xf32>
    %cst_28 = arith.constant dense<0.000000e+00> : vector<8x324xf32>
    %44 = tpu.matmul %43, %41, %cst_28 {dimension_numbers = #tpu.dot_dimension_numbers<[1], [0], [0], [1], [0, 0, 1, 1], [], []>} : vector<8x3xf32>, vector<3x324xf32>, vector<8x324xf32> -> vector<8x324xf32>
    %45 = arith.addf %40, %44 : vector<8x324xf32>
    %c0_29 = arith.constant 0 : index
    %c0_30 = arith.constant 0 : index
    %46 = vector.load %arg3[%c0_29, %c0_30] : memref<8x1xf32, #tpu.memory_space<vmem>>, vector<8x1xf32>
    %47 = vector.broadcast %46 : vector<8x1xf32> to vector<8x324xf32>
    %48 = arith.addf %45, %47 : vector<8x324xf32>
    %cst_31 = arith.constant 0.000000e+00 : f32
    %49 = vector.broadcast %cst_31 : f32 to vector<8x324xf32>
    %50 = arith.maximumf %48, %49 : vector<8x324xf32>
    %c0_32 = arith.constant 0 : index
    %c0_33 = arith.constant 0 : index
    %51 = vector.load %arg5[%c0_32, %c0_33] : memref<10x8xf32, #tpu.memory_space<vmem>>, vector<10x8xf32>
    %cst_34 = arith.constant dense<0.000000e+00> : vector<10x324xf32>
    %52 = tpu.matmul %51, %50, %cst_34 {dimension_numbers = #tpu.dot_dimension_numbers<[1], [0], [0], [1], [0, 0, 1, 1], [], []>} : vector<10x8xf32>, vector<8x324xf32>, vector<10x324xf32> -> vector<10x324xf32>
    %c0_35 = arith.constant 0 : index
    %c0_36 = arith.constant 0 : index
    %53 = vector.load %arg4[%c0_35, %c0_36] : memref<1x324xf32, #tpu.memory_space<vmem>>, vector<1x324xf32>
    %54 = vector.broadcast %53 : vector<1x324xf32> to vector<10x324xf32>
    %55 = arith.mulf %52, %54 : vector<10x324xf32>
    %cst_37 = arith.constant dense<0.000000e+00> : vector<10xf32>
    %56 = vector.multi_reduction <add>, %55, %cst_37 [1] : vector<10x324xf32> to vector<10xf32>
    %57 = vector.shape_cast %56 : vector<10xf32> to vector<10x1xf32>
    %c0_38 = arith.constant 0 : index
    %c0_39 = arith.constant 0 : index
    %58 = vector.load %arg6[%c0_38, %c0_39] : memref<10x1xf32, #tpu.memory_space<vmem>>, vector<10x1xf32>
    %59 = arith.addf %57, %58 : vector<10x1xf32>
    %c0_40 = arith.constant 0 : index
    %c0_41 = arith.constant 0 : index
    %c0_42 = arith.constant 0 : index
    %60 = vector.load %arg7[%c0_40, %c0_41, %c0_42] : memref<1x10x1xf32, #tpu.memory_space<vmem>>, vector<1x10x1xf32>
    %61 = vector.shape_cast %60 : vector<1x10x1xf32> to vector<10x1xf32>
    %62 = vector.shape_cast %59 : vector<10x1xf32> to vector<1x10x1xf32>
    tpu.vector_store %arg7[%c0_40, %c0_41, %c0_42], %62 {strides = array<i32>} : memref<1x10x1xf32, #tpu.memory_space<vmem>>, vector<1x10x1xf32>,
    return
  }
  func.func @transform_0(%arg0: i32) -> (i32, i32, i32) {
    %c0_i32 = arith.constant 0 : i32
    %c0_i32_0 = arith.constant 0 : i32
    %c0_i32_1 = arith.constant 0 : i32
    return %arg0, %c0_i32, %c0_i32_0 : i32, i32, i32
  }
  func.func @transform_1(%arg0: i32) -> (i32, i32, i32) {
    %c0_i32 = arith.constant 0 : i32
    %c0_i32_0 = arith.constant 0 : i32
    %c0_i32_1 = arith.constant 0 : i32
    %c0_i32_2 = arith.constant 0 : i32
    return %c0_i32, %c0_i32_0, %c0_i32_1 : i32, i32, i32
  }
  func.func @transform_2(%arg0: i32) -> (i32, i32) {
    %c0_i32 = arith.constant 0 : i32
    %c0_i32_0 = arith.constant 0 : i32
    %c0_i32_1 = arith.constant 0 : i32
    return %c0_i32, %c0_i32_0 : i32, i32
  }
  func.func @transform_3(%arg0: i32) -> (i32, i32) {
    %c0_i32 = arith.constant 0 : i32
    %c0_i32_0 = arith.constant 0 : i32
    %c0_i32_1 = arith.constant 0 : i32
    return %c0_i32, %c0_i32_0 : i32, i32
  }
  func.func @transform_4(%arg0: i32) -> (i32, i32) {
    %c0_i32 = arith.constant 0 : i32
    %c0_i32_0 = arith.constant 0 : i32
    %c0_i32_1 = arith.constant 0 : i32
    return %c0_i32, %c0_i32_0 : i32, i32
  }
  func.func @transform_5(%arg0: i32) -> (i32, i32) {
    %c0_i32 = arith.constant 0 : i32
    %c0_i32_0 = arith.constant 0 : i32
    %c0_i32_1 = arith.constant 0 : i32
    return %c0_i32, %c0_i32_0 : i32, i32
  }
  func.func @transform_6(%arg0: i32) -> (i32, i32, i32) {
    %c0_i32 = arith.constant 0 : i32
    %c0_i32_0 = arith.constant 0 : i32
    %c0_i32_1 = arith.constant 0 : i32
    return %arg0, %c0_i32, %c0_i32_0 : i32, i32, i32
  }
}

</mosaic_0001>

<bundles_post_ra>
// kernel: tpu_custom_call.1
= control target key start
LH: loop header
LB: loop body
LE: loop exit
PB: predicated region body
PF: predicated region fallthrough
CT: control target
= control target key end

     0   :  { %s2208_s21 = smov 0   ;;  %s2384_s0 = inlined_call_operand.vmem [shape: f32[2,3,362], index: 0, kind: input, shape index: {}]   ;;  %s2385_s1 = inlined_call_operand.vmem [shape: f32[9,8,3], index: 1, kind: input, shape index: {}]   ;;  %s2386_s2 = inlined_call_operand.vmem [shape: f32[8,1], index: 2, kind: input, shape index: {}]   ;;  %s2387_s3 = inlined_call_operand.vmem [shape: f32[1,324], index: 3, kind: input, shape index: {}]   ;;  %s2388_s4 = inlined_call_operand.vmem [shape: f32[10,8], index: 4, kind: input, shape index: {}]   ;;  %s2389_s5 = inlined_call_operand.vmem [shape: f32[10,1], index: 5, kind: input, shape index: {}]   ;;  %s2390_s6 = inlined_call_operand.vmem [shape: f32[2,10,1], index: 6, kind: output, shape index: {}]  }
   0x1 LB: > { %s1993_s22 = sadd.s32 4294967295, %s2160_s21   ;;  %p1997_p0 = scmp.ge.s32.totalorder %s2160_s21, 1  ;;  %s2160_s21 = sphi %s2208_s21, %s16_s21  }
   0x2   : > { %p212_p1 = scmp.lt.s32.totalorder %s2160_s21, 3 }
   0x4   : > { %p213_p2 = pnand %p1997_p0, %p212_p1 }
   0x5   : > { %p242_p3 = scmp.lt.s32.totalorder (!%p213_p2), %s1993_s22, 1  ;;  %s2164_s27 = smov (!%p213_p2), 127  }
   0x6   : > { %216 = sbr.rel (%p213_p2) target bundleno = 728 (0x2d8), region = 44  ;;  %s2165_s28 = smov (!%p213_p2), 126  }
   0x7   : > { %s2166_s29 = smov (!%p213_p2), 110   ;;  %s2167_s30 = smov (!%p213_p2), 109  }
   0x8   : > { %s2168_s7 = smov (!%p213_p2), 108   ;;  %s2169_s8 = smov (!%p213_p2), 92  }
   0x9   : > { %s2171_s9 = smov (!%p213_p2), 91   ;;  %s2172_s10 = smov (!%p213_p2), 90  }
   0xb   : > { %v2162_v0 = vmov 0.0   ;;  %vm2163_vm0 = vmmov 0   ;;  %s2392_s22 = smov (!%p242_p3, %s1993_s22), 1  ;;  %v2170_v4 = vmov 0   ;;  %v1719_v5 = vld [vmem:[%s2386_s2] sm:$0xff]  ;;  %vm273_vm1 = vcmask 1042432  }
   0xc   : > { %2082 = vmatprep.subr.mxu1 %v2162_v0  ;;  %2084 = vmatprep.mubr.msk.f32.mxu1 %vm2163_vm0, %v2162_v0  ;;  %s2132_s23 = smul.u32 12, %s2392_s22  ;;  %v2001_v6 = vld [vmem:[%s2385_s1 + $0x8] sm:$0xff]  ;;  %vm269_vm2 = vcmask 23552   ;;  %v254_v9 = vld [vmem:[%s2385_s1] sm:$0xff]  ;;  %vm266_vm3 = vcmask 1039360   ;;  %v2012_v12 = vld [vmem:[%s2385_s1 + $0x10] sm:$0xff] }
   0xd   : > { %344 = vmatprep.mubr.f32.mxu0 %v2162_v0  ;;  %2152 = vset.pattern.permute.xlu0 %v2170_v4  ;;  %vm579_vm4 = vcmask 1031168   ;;  %v2018_v19 = vld [vmem:[%s2385_s1 + $0x18] sm:$0xff]  ;;  %vm743_vm5 = vcmask 900096   ;;  %vm907_vm6 = vcmask 891904   ;;  %v2024_v28 = vld [vmem:[%s2385_s1 + $0x20] sm:$0xff]  ;;  %vm1071_vm7 = vcmask 883712  }
   0xe   : > { %s246_s26 = scalar_lea.vmem %s2384_s0, %s2132_s23  ;;  %v2030_v33 = vld [vmem:[%s2385_s1 + $0x28] sm:$0xff]  ;;  %vm1235_vm8 = vcmask 752640   ;;  %v2036_v38 = vld [vmem:[%s2385_s1 + $0x30] sm:$0xff]  ;;  %vm1399_vm9 = vcmask 744448   ;;  %v2042_v43 = vld [vmem:[%s2385_s1 + $0x38] sm:$0xff]  ;;  %vm1563_vm10 = vcmask 736256  }
   0xf   : > { %v253_v1 = vld [vmem:[%s246_s26 + $0x8] sm:$0x7]  ;;  %v2226_v2 = vld [vmem:[%s246_s26] sm:$0x77]  ;;  %vm1733_vm11 = vcmask 64512   ;;  %vm1916_vm12 = vcmask 556032  }
  0x10   : > { %264 = vrot.lane.b32.xlu0 %v253_v1, %s2164_s27  ;;  %260 = vrot.lane.b32.xlu1 %v2226_v2, %s2164_s27  ;;  %v259_v3 = vcombine.high %v2226_v2, %v2226_v2  ;;  %v2048_v50 = vld [vmem:[%s2385_s1 + $0x40] sm:$0xff]  ;;  %vm1921_vm13 = vcmask 1041408   ;;  %vm1925_vm14 = vcmask 549888   ;;  %s2060_s15 = sshll.u32 %s2392_s22, 4  ;;  %vm1934_vm15 = vcmask 7168  }
  0x11   : > { %v2356_v55 = vld [vmem:[%s2388_s4] sm:$0xff]  ;;  %s251_s20 = scalar_lea.vmem %s2390_s6, %s2060_s15 }
  0x14   : > { %577 = vrot.lane.b32.xlu0 %v253_v1, %s2165_s28  ;;  %573 = vrot.lane.b32.xlu1 %v2226_v2, %s2165_s28 }
  0x18   : > { %575 = vrot.lane.b32.xlu1 %v259_v3, %s2165_s28  ;;  %262 = vrot.lane.b32.xlu0 %v259_v3, %s2164_s27 }
  0x1c   : > { %741 = vrot.lane.b32.xlu1 %v253_v1, %s2166_s29  ;;  %739 = vrot.lane.b32.xlu0 %v259_v3, %s2166_s29 }
  0x20   : > { %903 = vrot.lane.b32.xlu1 %v259_v3, %s2167_s30  ;;  %737 = vrot.lane.b32.xlu0 %v2226_v2, %s2166_s29 }
  0x24   : > { %901 = vrot.lane.b32.xlu1 %v2226_v2, %s2167_s30  ;;  %905 = vrot.lane.b32.xlu0 %v253_v1, %s2167_s30 }
  0x28   : > { %1069 = vrot.lane.b32.xlu1 %v253_v1, %s2168_s7  ;;  %1067 = vrot.lane.b32.xlu0 %v259_v3, %s2168_s7 }
  0x2c   : > { %1231 = vrot.lane.b32.xlu1 %v259_v3, %s2169_s8  ;;  %1065 = vrot.lane.b32.xlu0 %v2226_v2, %s2168_s7 }
  0x30   : > { %1229 = vrot.lane.b32.xlu1 %v2226_v2, %s2169_s8  ;;  %1233 = vrot.lane.b32.xlu0 %v253_v1, %s2169_s8 }
  0x34   : > { %1397 = vrot.lane.b32.xlu1 %v253_v1, %s2171_s9  ;;  %1395 = vrot.lane.b32.xlu0 %v259_v3, %s2171_s9 }
  0x38   : > { %1559 = vrot.lane.b32.xlu1 %v259_v3, %s2172_s10  ;;  %1393 = vrot.lane.b32.xlu0 %v2226_v2, %s2171_s9 }
  0x3c   : > { %1557 = vrot.lane.b32.xlu1 %v2226_v2, %s2172_s10  ;;  %1561 = vrot.lane.b32.xlu0 %v253_v1, %s2172_s10 }
  0x40   : > { %1722 = vperm.xlu0 %2152, %v1719_v5  }
  0x82   : > { %v265_v7 = vpop.permute.xlu0 %264  ;;  %v261_v8 = vpop.permute.xlu1 %260 }
  0x83   : > { %2083 = vmatpush3.msk.msra.mxu1 %vm273_vm1, %v265_v7 }
  0x84   : > { %2085 = vmatmul.mubr.msk.f32.vlgmr.msra.gmra.mxu1 %vm269_vm2, %v2001_v6  ;;  %2087 = vmatprep.subr.mxu1 %v2162_v0 }
  0x85   : > { %2088 = vmatpush3.msk.msra.mxu1 %vm273_vm1, %v253_v1  ;;  %2089 = vmatprep.mubr.msk.f32.mxu1 %vm2163_vm0, %v2162_v0 }
  0x86   : > { %v578_v10 = vpop.permute.xlu0 %577  ;;  %v574_v11 = vpop.permute.xlu1 %573  ;;  %2092 = vmatprep.subr.mxu1 %v2162_v0 }
  0x88   : > { %2090 = vmatmul.mubr.msk.f32.vlgmr.msra.gmra.mxu1 %vm269_vm2, %v254_v9 }
  0x89   : > { %2093 = vmatpush3.msk.msra.mxu1 %vm273_vm1, %v578_v10  ;;  %2094 = vmatprep.mubr.msk.f32.mxu1 %vm2163_vm0, %v2162_v0 }
  0x8a   : > { %v576_v13 = vpop.permute.xlu1 %575  ;;  %v263_v14 = vpop.permute.xlu0 %262  ;;  %2097 = vmatprep.subr.mxu1 %v2162_v0 }
  0x8b   : > { %v268_v15 = vsel %vm266_vm3, %v263_v14, %v265_v7  ;;  %v267_v16 = vsel %vm266_vm3, %v261_v8, %v263_v14  ;;  %v581_v20 = vsel %vm579_vm4, %v576_v13, %v578_v10  ;;  %v580_v21 = vsel %vm579_vm4, %v574_v11, %v576_v13 }
  0x8c   : > { %2002 = vmatprep.subr.msk.mxu0 %vm273_vm1, %v268_v15  ;;  %2095 = vmatmul.mubr.msk.f32.vlgmr.msra.gmra.mxu1 %vm269_vm2, %v2012_v12 }
  0x8d   : > { %2003 = vmatpush1.msk.msra.mxu0 %vm273_vm1, %v267_v16  ;;  %2099 = vmatprep.mubr.msk.f32.mxu1 %vm2163_vm0, %v2162_v0 }
  0x8e   : > { %v742_v17 = vpop.permute.xlu1 %741  ;;  %2004 = vmatmul.mubr.msk.f32.vlgmr.msra.gmra.mxu0 %vm269_vm2, %v2001_v6  ;;  %2007 = vmatprep.subr.msk.mxu0 %vm273_vm1, %v259_v3  ;;  %v740_v18 = vpop.permute.xlu0 %739 }
  0x8f   : > { %2008 = vmatpush1.msk.msra.mxu0 %vm273_vm1, %v2226_v2  ;;  %2098 = vmatpush3.msk.msra.mxu1 %vm273_vm1, %v742_v17  ;;  %v745_v24 = vsel %vm743_vm5, %v740_v18, %v742_v17 }
  0x90   : > { %2013 = vmatprep.subr.msk.mxu0 %vm273_vm1, %v581_v20  ;;  %494 = vmatprep.mubr.f32.mxu0 %v2162_v0 }
  0x91   : > { %2102 = vmatprep.subr.mxu1 %v2162_v0  ;;  %2100 = vmatmul.mubr.msk.f32.vlgmr.msra.gmra.mxu1 %vm269_vm2, %v2018_v19 }
  0x92   : > { %v904_v22 = vpop.permute.xlu1 %903  ;;  %2009 = vmatmul.mubr.msk.f32.vlgmr.msra.gmra.mxu0 %vm269_vm2, %v254_v9  ;;  %v738_v23 = vpop.permute.xlu0 %737  ;;  %2104 = vmatprep.mubr.msk.f32.mxu1 %vm2163_vm0, %v2162_v0 }
  0x93   : > { %2014 = vmatpush1.msk.msra.mxu0 %vm273_vm1, %v580_v21  ;;  %655 = vmatprep.mubr.f32.mxu0 %v2162_v0  ;;  %v744_v25 = vsel %vm743_vm5, %v738_v23, %v740_v18 }
  0x94   : > { %2019 = vmatprep.subr.msk.mxu0 %vm273_vm1, %v745_v24 }
  0x96   : > { %v902_v26 = vpop.permute.xlu1 %901  ;;  %2015 = vmatmul.mubr.msk.f32.vlgmr.msra.gmra.mxu0 %vm269_vm2, %v2012_v12  ;;  %v906_v27 = vpop.permute.xlu0 %905 }
  0x97   : > { %2020 = vmatpush1.msk.msra.mxu0 %vm273_vm1, %v744_v25  ;;  %v909_v29 = vsel %vm907_vm6, %v904_v22, %v906_v27  ;;  %2103 = vmatpush3.msk.msra.mxu1 %vm273_vm1, %v906_v27  ;;  %v908_v30 = vsel %vm907_vm6, %v902_v26, %v904_v22 }
  0x98   : > { %2025 = vmatprep.subr.msk.mxu0 %vm273_vm1, %v909_v29  ;;  %819 = vmatprep.mubr.f32.mxu0 %v2162_v0 }
  0x99   : > { %2107 = vmatprep.subr.mxu1 %v2162_v0  ;;  %2105 = vmatmul.mubr.msk.f32.vlgmr.msra.gmra.mxu1 %vm269_vm2, %v2024_v28 }
  0x9a   : > { %v1070_v31 = vpop.permute.xlu1 %1069  ;;  %2021 = vmatmul.mubr.msk.f32.vlgmr.msra.gmra.mxu0 %vm269_vm2, %v2018_v19  ;;  %v1068_v32 = vpop.permute.xlu0 %1067  ;;  %2109 = vmatprep.mubr.msk.f32.mxu1 %vm2163_vm0, %v2162_v0 }
  0x9b   : > { %2026 = vmatpush1.msk.msra.mxu0 %vm273_vm1, %v908_v30  ;;  %v1073_v34 = vsel %vm1071_vm7, %v1068_v32, %v1070_v31  ;;  %2108 = vmatpush3.msk.msra.mxu1 %vm273_vm1, %v1070_v31 }
  0x9c   : > { %2031 = vmatprep.subr.msk.mxu0 %vm273_vm1, %v1073_v34  ;;  %983 = vmatprep.mubr.f32.mxu0 %v2162_v0 }
  0x9d   : > { %2110 = vmatmul.mubr.msk.f32.vlgmr.msra.gmra.mxu1 %vm269_vm2, %v2030_v33  ;;  %2112 = vmatprep.subr.mxu1 %v2162_v0 }
  0x9e   : > { %v1232_v35 = vpop.permute.xlu1 %1231  ;;  %2027 = vmatmul.mubr.msk.f32.vlgmr.msra.gmra.mxu0 %vm269_vm2, %v2024_v28  ;;  %v1066_v36 = vpop.permute.xlu0 %1065  ;;  %2114 = vmatprep.mubr.msk.f32.mxu1 %vm2163_vm0, %v2162_v0 }
  0x9f   : > { %v1072_v37 = vsel %vm1071_vm7, %v1066_v36, %v1068_v32  ;;  %1147 = vmatprep.mubr.f32.mxu0 %v2162_v0 }
  0xa0   : > { %2032 = vmatpush1.msk.msra.mxu0 %vm273_vm1, %v1072_v37 }
  0xa2   : > { %v1230_v39 = vpop.permute.xlu1 %1229  ;;  %2033 = vmatmul.mubr.msk.f32.vlgmr.msra.gmra.mxu0 %vm269_vm2, %v2030_v33  ;;  %v1234_v40 = vpop.permute.xlu0 %1233 }
  0xa3   : > { %v1236_v41 = vsel %vm1235_vm8, %v1230_v39, %v1232_v35  ;;  %v1237_v42 = vsel %vm1235_vm8, %v1232_v35, %v1234_v40  ;;  %2113 = vmatpush3.msk.msra.mxu1 %vm273_vm1, %v1234_v40  ;;  %1311 = vmatprep.mubr.f32.mxu0 %v2162_v0 }
  0xa4   : > { %2037 = vmatprep.subr.msk.mxu0 %vm273_vm1, %v1237_v42  ;;  %2115 = vmatmul.mubr.msk.f32.vlgmr.msra.gmra.mxu1 %vm269_vm2, %v2036_v38 }
  0xa5   : > { %2038 = vmatpush1.msk.msra.mxu0 %vm273_vm1, %v1236_v41  ;;  %2117 = vmatprep.subr.mxu1 %v2162_v0 }
  0xa6   : > { %v1398_v44 = vpop.permute.xlu1 %1397  ;;  %2039 = vmatmul.mubr.msk.f32.vlgmr.msra.gmra.mxu0 %vm269_vm2, %v2036_v38  ;;  %v1396_v45 = vpop.permute.xlu0 %1395  ;;  %2119 = vmatprep.mubr.msk.f32.mxu1 %vm2163_vm0, %v2162_v0 }
  0xa7   : > { %v1401_v46 = vsel %vm1399_vm9, %v1396_v45, %v1398_v44  ;;  %2118 = vmatpush3.msk.msra.mxu1 %vm273_vm1, %v1398_v44  ;;  %1475 = vmatprep.mubr.f32.mxu0 %v2162_v0 }
  0xa8   : > { %2043 = vmatprep.subr.msk.mxu0 %vm273_vm1, %v1401_v46  ;;  %2120 = vmatmul.mubr.msk.f32.vlgmr.msra.gmra.mxu1 %vm269_vm2, %v2042_v43 }
  0xa9   : > { %2122 = vmatprep.subr.mxu1 %v2162_v0  ;;  %2124 = vmatprep.mubr.msk.f32.mxu1 %vm2163_vm0, %v2162_v0  ;;  %vm1936_vm0 = vcmask 1024  }
  0xaa   : > { %v1560_v47 = vpop.permute.xlu1 %1559  ;;  %v1394_v48 = vpop.permute.xlu0 %1393 }
  0xab   : > { %v1400_v49 = vsel %vm1399_vm9, %v1394_v48, %v1396_v45 }
  0xac   : > { %2044 = vmatpush1.msk.msra.mxu0 %vm273_vm1, %v1400_v49 }
  0xad   : > { %2045 = vmatmul.mubr.msk.f32.vlgmr.msra.gmra.mxu0 %vm269_vm2, %v2042_v43 }
  0xae   : > { %v1558_v51 = vpop.permute.xlu1 %1557  ;;  %v1562_v52 = vpop.permute.xlu0 %1561  ;;  %1639 = vmatprep.mubr.f32.mxu0 %v2162_v0 }
  0xaf   : > { %v1564_v53 = vsel %vm1563_vm10, %v1558_v51, %v1560_v47  ;;  %v1565_v54 = vsel %vm1563_vm10, %v1560_v47, %v1562_v52  ;;  %2123 = vmatpush3.msk.msra.mxu1 %vm273_vm1, %v1562_v52 }
  0xb0   : > { %2049 = vmatprep.subr.msk.mxu0 %vm273_vm1, %v1565_v54  ;;  %2125 = vmatmul.mubr.msk.f32.vlgmr.msra.gmra.mxu1 %vm269_vm2, %v2048_v50 }
  0xb1   : > { %2050 = vmatpush1.msk.msra.mxu0 %vm273_vm1, %v1564_v53  ;;  %2129 = vmatprep.mubr.msk.f32.mxu1 %vm1733_vm11, %v2356_v55 }
  0xb2   : > { %2051 = vmatmul.mubr.msk.f32.vlgmr.msra.gmra.mxu0 %vm269_vm2, %v2048_v50 }
  0xb3   : > { %1804 = vmatprep.mubr.f32.mxu0 %v2162_v0 }
  0xbb   : > { %v1723_v44 = vpop.permute.xlu0 %1722 }
 0x144   : > { %v417_v56 = vpop.f32.mrf.mxu1 }
 0x146   : > { %v2086_v57 = vpop.f32.mrf.mxu1 }
 0x148   : > { %v567_v58 = vpop.f32.mrf.mxu1 }
 0x149   : > { %v568_v7 = vadd.f32 %v567_v58, %v417_v56  ;;  %v1732_v58 = vld [vmem:[%s2388_s4 + $0x8] sm:$0x3] }
 0x14a   : > { %v2091_v59 = vpop.f32.mrf.mxu1 }
 0x14c   : > { %v728_v60 = vpop.f32.mrf.mxu1 }
 0x14d   : > { %v734_v12 = vadd.f32 %v728_v60, %v568_v7 }
 0x14e   : > { %v346_v61 = vpop.f32.mrf.mxu0  ;;  %v2096_v62 = vpop.f32.mrf.mxu1 }
 0x14f   : > { %v1894_v62 = vlaneseq }
 0x150   : > { %v348_v63 = vpop.f32.mrf.mxu0 }
 0x151   : > { %v892_v1 = vpop.f32.mrf.mxu1 }
 0x152   : > { %v496_v2 = vpop.f32.mrf.mxu0  ;;  %v898_v17 = vadd.f32 %v892_v1, %v734_v12 }
 0x153   : > { %v2101_v3 = vpop.f32.mrf.mxu1  ;;  %v497_v21 = vadd.f32 %v496_v2, %v346_v61  ;;  %v1892_v2 = vld [vmem:[%s2387_s3] sm:$0x7] }
 0x154   : > { %v498_v4 = vpop.f32.mrf.mxu0 }
 0x155   : > { %v499_v24 = vadd.f32 %v498_v4, %v348_v63  ;;  %v1895_v63 = vshrl.u32 %v1894_v62, 7 }
 0x156   : > { %v657_v5 = vpop.f32.mrf.mxu0 }
 0x157   : > { %v732_v25 = vadd.f32 %v657_v5, %v497_v21  ;;  %v1904_v1 = vsub.s32 2, %v1895_v63  ;;  %v1896_v3 = vsub.s32 0, %v1895_v63  ;;  %v1900_v4 = vsub.s32 1, %v1895_v63 }
 0x158   : > { %v659_v6 = vpop.f32.mrf.mxu0 }
 0x159   : > { %v1056_v8 = vpop.f32.mrf.mxu1  ;;  %v733_v28 = vadd.f32 %v659_v6, %v499_v24  ;;  %v1905_v6 = vrot.slane %v1892_v2, %v1904_v1 }
 0x15a   : > { %v821_v9 = vpop.f32.mrf.mxu0  ;;  %v1062_v22 = vadd.f32 %v1056_v8, %v898_v17  ;;  %v1897_v8 = vrot.slane %v1892_v2, %v1896_v3 }
 0x15b   : > { %v2106_v10 = vpop.f32.mrf.mxu1  ;;  %v896_v29 = vadd.f32 %v821_v9, %v732_v25  ;;  %v1901_v9 = vrot.slane %v1892_v2, %v1900_v4 }
 0x15c   : > { %v823_v11 = vpop.f32.mrf.mxu0 }
 0x15d   : > { %v1220_v13 = vpop.f32.mrf.mxu1  ;;  %v897_v32 = vadd.f32 %v823_v11, %v733_v28 }
 0x15e   : > { %v985_v14 = vpop.f32.mrf.mxu0  ;;  %v1226_v30 = vadd.f32 %v1220_v13, %v1062_v22 }
 0x15f   : > { %v2111_v15 = vpop.f32.mrf.mxu1  ;;  %v1060_v33 = vadd.f32 %v985_v14, %v896_v29  ;;  %v1931_v29 = vld [vmem:[%s2389_s5 + $0x8] sm:$0x3] }
 0x160   : > { %v987_v16 = vpop.f32.mrf.mxu0 }
 0x161   : > { %v1061_v35 = vadd.f32 %v987_v16, %v897_v32 }
 0x162   : > { %v1149_v18 = vpop.f32.mrf.mxu0 }
 0x163   : > { %v1224_v36 = vadd.f32 %v1149_v18, %v1060_v33 }
 0x164   : > { %v1151_v19 = vpop.f32.mrf.mxu0  ;;  %v1384_v20 = vpop.f32.mrf.mxu1 }
 0x165   : > { %v1390_v37 = vadd.f32 %v1384_v20, %v1226_v30  ;;  %v1225_v39 = vadd.f32 %v1151_v19, %v1061_v35 }
 0x166   : > { %v2116_v23 = vpop.f32.mrf.mxu1  ;;  %v1313_v26 = vpop.f32.mrf.mxu0 }
 0x167   : > { %v1388_v40 = vadd.f32 %v1313_v26, %v1224_v36  ;;  %v1930_v26 = vld [vmem:[%s2389_s5] sm:$0xff] }
 0x168   : > { %v1548_v27 = vpop.f32.mrf.mxu1  ;;  %v1315_v34 = vpop.f32.mrf.mxu0 }
 0x169   : > { %v1554_v41 = vadd.f32 %v1548_v27, %v1390_v37  ;;  %v1389_v45 = vadd.f32 %v1315_v34, %v1225_v39 }
 0x16a   : > { %v2121_v31 = vpop.f32.mrf.mxu1 }
 0x16d   : > { %v1477_v38 = vpop.f32.mrf.mxu0 }
 0x16e   : > { %v1552_v46 = vadd.f32 %v1477_v38, %v1388_v40 }
 0x16f   : > { %v1479_v42 = vpop.f32.mrf.mxu0 }
 0x170   : > { %v1712_v43 = vpop.f32.mrf.mxu1  ;;  %v1553_v50 = vadd.f32 %v1479_v42, %v1389_v45 }
 0x171   : > { %v1718_v47 = vadd.f32 %v1712_v43, %v1554_v41 }
 0x172   : > { %v1641_v48 = vpop.f32.mrf.mxu0  ;;  %v2126_v49 = vpop.f32.mrf.mxu1 }
 0x173   : > { %v1716_v51 = vadd.f32 %v1641_v48, %v1552_v46  ;;  %v1727_v52 = vadd.f32 %v1723_v44, %v1718_v47 }
 0x174   : > { %v1643_v53 = vpop.f32.mrf.mxu0 }
 0x175   : > { %v1717_v54 = vadd.f32 %v1643_v53, %v1553_v50  ;;  %v1730_v56 = vmax.f32 %v1727_v52, 0.0  ;;  %v1725_v57 = vadd.f32 %v1723_v44, %v1716_v51 }
 0x177   : > { %v1726_v59 = vadd.f32 %v1723_v44, %v1717_v54  ;;  %2127 = vmatprep.subr.mxu1 %v1730_v56  ;;  %v1728_v61 = vmax.f32 %v1725_v57, 0.0 }
 0x178   : > { %2128 = vmatpush3.msra.mxu1 %v1730_v56 }
 0x179   : > { %v1729_v60 = vmax.f32 %v1726_v59, 0.0  ;;  %2130 = vmatmul.mubr.msk.f32.vlgmr.msra.gmra.mxu1 %vm1733_vm11, %v1732_v58 }
 0x17b   : > { %1770 = vmatprep.subr.mxu0 %v1729_v60 }
 0x17c   : > { %1771 = vmatpush1.msra.mxu0 %v1728_v61 }
 0x17d   : > { %2054 = vmatmul.mubr.msk.f32.vlgmr.msra.gmra.mxu0 %vm1733_vm11, %v2356_v55 }
 0x17e   : > { %1810 = vmatprep.mubr.f32.mxu0 %v2162_v0 }
 0x181   : > { %2055 = vmatmul.mubr.msk.f32.gmra.mxu0 %vm1733_vm11, %v1732_v58 }
 0x239   : > { %v2131_v5 = vpop.f32.mrf.mxu1 }
 0x23a   : > { %v1914_v18 = vmul.f32 %v2131_v5, %v1905_v6 }
 0x23b   : > { %v1883_v7 = vpop.f32.mrf.mxu1 }
 0x23c   : > { %v1911_v55 = vmul.f32 %v1905_v6, %v1883_v7  ;;  %v1926_v24 = vsel %vm1925_vm14, %v1914_v18, 0.0 }
 0x23d   : > { %v1806_v10 = vpop.f32.mrf.mxu0 }
 0x23e   : > { %v1909_v11 = vmul.f32 %v1897_v8, %v1806_v10  ;;  %v1917_v14 = vsel %vm1916_vm12, %v1911_v55, 0.0 }
 0x23f   : > { %v1808_v0 = vpop.f32.mrf.mxu0 }
 0x240   : > { %v1910_v12 = vmul.f32 %v1901_v9, %v1808_v0 }
 0x241   : > { %v1812_v13 = vpop.f32.mrf.mxu0 }
 0x242   : > { %v1915_v15 = vadd.f32 %v1910_v12, %v1909_v11  ;;  %v1912_v16 = vmul.f32 %v1897_v8, %v1812_v13 }
 0x243   : > { %v1814_v17 = vpop.f32.mrf.mxu0 }
 0x244   : > { %v1913_v19 = vmul.f32 %v1901_v9, %v1814_v17  ;;  %v1918_v20 = vadd.f32 %v1917_v14, %v1915_v15  ;;  %v1922_v21 = vsel %vm1921_vm13, %v1912_v16, 0.0 }
 0x246   : > { %v1923_v22 = vsel %vm1921_vm13, %v1913_v19, 0.0  ;;  %1919 = vadd.xlane.f32.xlu1 %v1918_v20 }
 0x247   : > { %v1924_v23 = vadd.f32 %v1923_v22, %v1922_v21 }
 0x249   : > { %v1927_v25 = vadd.f32 %v1926_v24, %v1924_v23 }
 0x24b   : > { %1928 = vadd.xlane.f32.xlu0 %v1927_v25 }
 0x2cf   : > { %v1920_v27 = vpop.xlane.xlu1 %1919 }
 0x2d0   : > { %v1932_v28 = vadd.f32 %v1930_v26, %v1920_v27 }
 0x2d2   : > { %1935 = vst.msk [vmem:[%s251_s20] sm:$0xff] %vm1934_vm15, %v1932_v28 }
 0x2d4   : > { %v1929_v30 = vpop.xlane.xlu0 %1928 }
 0x2d5   : > { %v1933_v31 = vadd.f32 %v1931_v29, %v1929_v30 }
 0x2d7   : > { %1937 = vst.msk [vmem:[%s251_s20 + $0x8] sm:$0x3] %vm1936_vm0, %v1933_v31 }
 0x2d8 PF: > { %s16_s21 = sadd.s32 1, %s2160_s21  }
 0x2d9   : > { %p13_p4 = scmp.ge.s32.totalorder %s16_s21, 4  }
 0x2db   :  { %15 = sbr.rel (!%p13_p4) target bundleno = 1 (0x1), region = 82 }

</bundles_post_ra>
